<compile_context>
chip_gen: v6e
topology: v6e:2x2x1
jax: 0.10.0
libtpu: 0.0.40
codegen_flags: <defaults>
</compile_context>

<pallas_src>
import functools

import jax
import jax.numpy as jnp
from jax.experimental import pallas as pl
from jax.experimental.pallas import tpu as pltpu


def _round_up(x, m):
    return ((x + m - 1) // m) * m


def _density_loss_kernel(x_ref, lcol_ref, lrow_ref, out_ref, *, tm, tn):
    # x_ref:    (tm, tn) input tile (native dtype); edge tiles may hold garbage
    #           past N -- killed by the sentinel-label mask below.
    # lcol_ref: (tm, 1)  int32 row labels (padded rows hold sentinel min-1)
    # lrow_ref: (1, tn)  int32 col labels (padded cols hold sentinel min-2)
    # out_ref:  (8, tn)  f32 accumulator block, resident across the j axis
    j = pl.program_id(1)

    @pl.when(j == 0)
    def _():
        out_ref[...] = jnp.zeros_like(out_ref)

    # Pairwise label-equality mask via broadcast: (tm, 1) == (1, tn).
    # Distinct sentinels in the padding guarantee padded / OOB positions never
    # match, so no iota validity mask is needed.
    mask = lcol_ref[...] == lrow_ref[...]

    # Mask ahead of the log: unselected lanes become log(1.0) == 0 exactly.
    x = x_ref[...].astype(jnp.float32)
    masked = jnp.log(jnp.where(mask, x + jnp.float32(1e-8), jnp.float32(1.0)))

    # Fold the (tm, tn) tile into an (8, tn) vreg-aligned partial with pure
    # element-wise vadds; defer the cross-lane reduce to the wrapper epilogue.
    out_ref[...] += jnp.sum(masked.reshape(tm // 8, 8, tn), axis=0)


def density_loss(x, label, *, tm=1024, tn=2048):
    """x: (N, N) float (any dtype), label: (N,) int -> scalar float32 loss.

    Note: for tiny N a plain-XLA fallback would be as fast (Pallas launch/DMA
    overhead dominates); the Pallas path is kept unconditional so it is
    exercised by the test.
    """
    n = x.shape[0]
    assert x.shape == (n, n), x.shape

    n8 = _round_up(n, 8)
    n128 = _round_up(n, 128)

    # Tile selection: largest streaming tile that keeps the double-buffered x
    # working set modest (<= 16 MiB f32 at the defaults -> safe on v7x's
    # 64 MiB/TC VMEM as well as v5e/v6e).
    tm = min(_round_up(tm, 8), n8)
    tn = min(_round_up(tn, 128), n128)
    # Guarantee >= 2 row tiles whenever possible so the "parallel" row axis can
    # shard across v7x's two TensorCores.
    if tm >= n8 and n8 > 8:
        tm = _round_up((n8 + 1) // 2, 8)

    gi = pl.cdiv(n, tm)
    gj = pl.cdiv(n, tn)
    pad_r = gi * tm - n
    pad_c = gj * tn - n

    # x streamed UNPADDED; only the tiny label vectors are padded (sentinels).
    lab = label.reshape(-1).astype(jnp.int32)
    lcol = lab.reshape(n, 1)
    lrow = lab.reshape(1, n)
    if pad_r or pad_c:
        # Distinct sentinels strictly below every real label so padded rows,
        # padded cols and pad-row x pad-col pairs can never match.
        # (Assumes min(label) > INT32_MIN + 2, true for any realistic labels.)
        smin = jnp.min(lab)
        if pad_r:
            lcol = jnp.concatenate(
                [lcol, jnp.full((pad_r, 1), smin - 1, jnp.int32)], axis=0)
        if pad_c:
            lrow = jnp.concatenate(
                [lrow, jnp.full((1, pad_c), smin - 2, jnp.int32)], axis=1)

    kernel = functools.partial(_density_loss_kernel, tm=tm, tn=tn)

    cost = pl.CostEstimate(
        flops=3 * n * n,
        transcendentals=n * n,
        bytes_accessed=(n * n * x.dtype.itemsize
                        + (gi * tm + gj * tn) * 4
                        + gi * 8 * tn * 4),
    )

    partials = pl.pallas_call(
        kernel,
        out_shape=jax.ShapeDtypeStruct((gi * 8, tn), jnp.float32),
        grid_spec=pltpu.PrefetchScalarGridSpec(
            num_scalar_prefetch=0,
            grid=(gi, gj),                                    # reduction axis last
            in_specs=[
                pl.BlockSpec((tm, tn), lambda i, j: (i, j)),  # x tile (edge OK)
                pl.BlockSpec((tm, 1), lambda i, j: (i, 0)),   # row labels
                pl.BlockSpec((1, tn), lambda i, j: (0, j)),   # col labels
            ],
            out_specs=pl.BlockSpec((8, tn), lambda i, j: (i, 0)),
        ),
        compiler_params=pltpu.CompilerParams(
            dimension_semantics=("parallel", "arbitrary"),
            # Raise the scoped-VMEM limit (v5e defaults to 16 MiB) so the
            # double-buffered 8 MiB x tiles fit; still well under v7x's
            # 64 MiB/TC physical VMEM.
            vmem_limit_bytes=32 * 1024 * 1024,
        ),
        cost_estimate=cost,
    )(x, lcol, lrow)

    # Epilogue: one tiny cross-lane reduce, negate, and mean over rows (== /N).
    return -jnp.sum(partials) / jnp.float32(n)


def _reference(x, label):
    target = (label[:, None] == label[None, :]).astype(jnp.float32)
    log_input = jnp.log(x.astype(jnp.float32) + 1e-8)
    return jnp.mean(jnp.sum(-target * log_input, axis=1))


if __name__ == "__main__":
    key = jax.random.PRNGKey(0)
    k1, k2, k3, k4 = jax.random.split(key, 4)

    # Case 1: module's small shape (N=16), default tiles -> tm split to 8 so
    # the "parallel" row axis has 2 tiles; single padded column tile.
    N1 = 16
    x1 = jax.random.uniform(k1, (N1, N1), dtype=jnp.float32, minval=0.0, maxval=1.0)
    l1 = jax.random.randint(k2, (N1,), 0, 4, dtype=jnp.int32)
    out1 = jax.block_until_ready(density_loss(x1, l1))
    ref1 = jax.block_until_ready(_reference(x1, l1))
    assert jnp.allclose(out1, ref1, rtol=1e-5, atol=1e-5), (out1, ref1)

    # Case 2: non-tile-aligned N exercising the 2D grid, unpadded-x edge
    # blocks, sentinel-padded labels and the resident accumulator
    # (tm=64, tn=128 -> grid (4, 2)).
    N2 = 200
    x2 = jax.random.uniform(k3, (N2, N2), dtype=jnp.float32, minval=0.0, maxval=1.0)
    l2 = jax.random.randint(k4, (N2,), 0, 7, dtype=jnp.int32)
    out2 = jax.block_until_ready(density_loss(x2, l2, tm=64, tn=128))
    ref2 = jax.block_until_ready(_reference(x2, l2))
    assert jnp.allclose(out2, ref2, rtol=1e-4, atol=1e-4), (out2, ref2)

    # Case 3: same data through the default (large-tile) path with the
    # megacore row split and both row/col sentinel padding active.
    out3 = jax.block_until_ready(density_loss(x2, l2))
    assert jnp.allclose(out3, ref2, rtol=1e-4, atol=1e-4), (out3, ref2)

    print("KERNEL_OK")
</pallas_src>

<mosaic_0001>
module attributes {stable_mosaic.version = 11 : i64} {
  func.func @_density_loss_kernel(%arg0: i32, %arg1: i32, %arg2: memref<8x128xf32, #tpu.memory_space<vmem>>, %arg3: memref<8x1xi32, #tpu.memory_space<vmem>>, %arg4: memref<1x128xi32, #tpu.memory_space<vmem>>, %arg5: memref<8x128xf32, #tpu.memory_space<vmem>>) attributes {dimension_semantics = [#tpu.dimension_semantics<parallel>, #tpu.dimension_semantics<arbitrary>], iteration_bounds = array<i64: 2, 1>, scalar_prefetch = 0 : i64, scratch_operands = 0 : i64, tpu.core_type = #tpu.core_type<tc>, window_params = [{transform_indices = @transform_0, window_bounds = array<i64: 8, 128>}, {transform_indices = @transform_1, window_bounds = array<i64: 8, 1>}, {transform_indices = @transform_2, window_bounds = array<i64: 1, 128>}, {transform_indices = @transform_3, window_bounds = array<i64: 8, 128>}]} {
    %c0_i32 = arith.constant 0 : i32
    %0 = arith.cmpi eq, %arg1, %c0_i32 : i32
    %1 = arith.extui %0 : i1 to i32
    %c0_i32_0 = arith.constant 0 : i32
    %2 = arith.cmpi ne, %1, %c0_i32_0 : i32
    scf.if %2 {
      %cst_12 = arith.constant 0.000000e+00 : f32
      %19 = vector.broadcast %cst_12 : f32 to vector<8x128xf32>
      %c0_13 = arith.constant 0 : index
      %c0_14 = arith.constant 0 : index
      %20 = vector.load %arg5[%c0_13, %c0_14] : memref<8x128xf32, #tpu.memory_space<vmem>>, vector<8x128xf32>
      tpu.vector_store %arg5[%c0_13, %c0_14], %19 {strides = array<i32>} : memref<8x128xf32, #tpu.memory_space<vmem>>, vector<8x128xf32>,
    } else {
    }
    %c0 = arith.constant 0 : index
    %c0_1 = arith.constant 0 : index
    %3 = vector.load %arg3[%c0, %c0_1] : memref<8x1xi32, #tpu.memory_space<vmem>>, vector<8x1xi32>
    %c0_2 = arith.constant 0 : index
    %c0_3 = arith.constant 0 : index
    %4 = vector.load %arg4[%c0_2, %c0_3] : memref<1x128xi32, #tpu.memory_space<vmem>>, vector<1x128xi32>
    %5 = vector.broadcast %3 : vector<8x1xi32> to vector<8x128xi32>
    %6 = vector.broadcast %4 : vector<1x128xi32> to vector<8x128xi32>
    %7 = arith.cmpi eq, %5, %6 : vector<8x128xi32>
    %c0_4 = arith.constant 0 : index
    %c0_5 = arith.constant 0 : index
    %8 = vector.load %arg2[%c0_4, %c0_5] : memref<8x128xf32, #tpu.memory_space<vmem>>, vector<8x128xf32>
    %cst = arith.constant 9.99999993E-9 : f32
    %9 = vector.broadcast %cst : f32 to vector<8x128xf32>
    %10 = arith.addf %8, %9 : vector<8x128xf32>
    %cst_6 = arith.constant 1.000000e+00 : f32
    %11 = vector.broadcast %cst_6 : f32 to vector<8x128xf32>
    %12 = arith.select %7, %10, %11 : vector<8x128xi1>, vector<8x128xf32>
    %13 = math.log %12 : vector<8x128xf32>
    %c0_7 = arith.constant 0 : index
    %c0_8 = arith.constant 0 : index
    %14 = vector.load %arg5[%c0_7, %c0_8] : memref<8x128xf32, #tpu.memory_space<vmem>>, vector<8x128xf32>
    %15 = vector.shape_cast %13 : vector<8x128xf32> to vector<1x8x128xf32>
    %cst_9 = arith.constant dense<0.000000e+00> : vector<8x128xf32>
    %16 = vector.multi_reduction <add>, %15, %cst_9 [0] : vector<1x8x128xf32> to vector<8x128xf32>
    %17 = arith.addf %14, %16 : vector<8x128xf32>
    %c0_10 = arith.constant 0 : index
    %c0_11 = arith.constant 0 : index
    %18 = vector.load %arg5[%c0_10, %c0_11] : memref<8x128xf32, #tpu.memory_space<vmem>>, vector<8x128xf32>
    tpu.vector_store %arg5[%c0_10, %c0_11], %17 {strides = array<i32>} : memref<8x128xf32, #tpu.memory_space<vmem>>, vector<8x128xf32>,
    return
  }
  func.func @transform_0(%arg0: i32, %arg1: i32) -> (i32, i32) {
    %c0_i32 = arith.constant 0 : i32
    return %arg0, %arg1 : i32, i32
  }
  func.func @transform_1(%arg0: i32, %arg1: i32) -> (i32, i32) {
    %c0_i32 = arith.constant 0 : i32
    %c0_i32_0 = arith.constant 0 : i32
    return %arg0, %c0_i32 : i32, i32
  }
  func.func @transform_2(%arg0: i32, %arg1: i32) -> (i32, i32) {
    %c0_i32 = arith.constant 0 : i32
    %c0_i32_0 = arith.constant 0 : i32
    return %c0_i32, %arg1 : i32, i32
  }
  func.func @transform_3(%arg0: i32, %arg1: i32) -> (i32, i32) {
    %c0_i32 = arith.constant 0 : i32
    %c0_i32_0 = arith.constant 0 : i32
    return %arg0, %c0_i32 : i32, i32
  }
}

</mosaic_0001>

<bundles_post_ra>
// kernel: tpu_custom_call.1
= control target key start
LH: loop header
LB: loop body
LE: loop exit
PB: predicated region body
PF: predicated region fallthrough
CT: control target
= control target key end

     0   :  { %8 = vsyncpa [#allocation3], 0  ;;  %s631_s0 = inlined_call_operand.vmem [shape: f32[16,16], index: 0, kind: input, shape index: {}]   ;;  %s632_s1 = inlined_call_operand.vmem [shape: s32[16,1], index: 1, kind: input, shape index: {}]   ;;  %s633_s2 = inlined_call_operand.vmem [shape: s32[1,128], index: 2, kind: input, shape index: {}]   ;;  %s634_s3 = inlined_call_operand.hbm [shape: f32[16,128], index: 3, kind: output, shape index: {}]  }
   0x1   :  { %10 = vsyncpa [#allocation3 + $0x1], 0  ;;  %s526_s12 = smov 0   ;;  %s528_s13 = smov 0  }
   0x2   :  { %s530_s14 = smov 0   ;;  %s532_s15 = smov 0  }
   0x3   :  { %s534_s16 = smov 0   ;;  %s536_s17 = smov 0  }
   0x4 LB: > { %s352_s18 = sadd.s32 4294967295, %s502_s17   ;;  %s353_s19 = sadd.s32 4294967294, %s502_s17   ;;  %s502_s17 = sphi %s536_s17, %s16_s17   ;;  %s498_s16 = sphi %s534_s16, %s641_s16   ;;  %s494_s15 = sphi %s532_s15, %s640_s15   ;;  %s490_s14 = sphi %s530_s14, %s639_s14   ;;  %s486_s13 = sphi %s528_s13, %s638_s13   ;;  %s482_s12 = sphi %s526_s12, %s637_s12  }
   0x5   : > { %s28_s20 = sadd.s32 1, %s498_s16  ;;  %s115_s21 = sadd.s32 1, %s490_s14 }
   0x6   : > { %p30_p0 = scmp.ge.s32.totalorder %s28_s20, 2  ;;  %p125_p1 = scmp.ne.s32.totalorder %s490_s14, %s486_s13 }
   0x7   : > { %p126_p2 = scmp.eq.s32.totalorder %s352_s18, 1  ;;  %p131_p3 = scmp.ne.s32.totalorder %s486_s13, %s482_s12 }
   0x8   : > { %s643_s20 = smov (%p30_p0, %s28_s20), 0  ;;  %p132_p5 = scmp.eq.s32.totalorder %s353_s19, 1 }
   0x9   : > { %p566_p4 = por %p126_p2, %p125_p1  ;;  %s112_s23 = ssub.s32 %s498_s16, %s643_s20 }
   0xa   : > { %p357_p6 = scmp.ge.s32.totalorder %s502_s17, 1  ;;  %p113_p7 = scmp.eq.s32.totalorder %s112_s23, 0 }
   0xb   : > { %p573_p8 = por %p132_p5, %p131_p3  ;;  %p173_p9 = scmp.lt.s32.totalorder %s502_s17, 3 }
   0xc   : > { %s579_s25 = scalar_select %p113_p7, %s490_s14, %s115_s21  }
   0xd   : > { %p174_p10 = pnand %p357_p6, %p173_p9 }
   0xe   : > { %p206_p11 = scmp.lt.s32.totalorder (!%p174_p10), %s494_s15, 1  ;;  %s203_s9 = sand.u32 (!%p174_p10), 1, %s486_s13  }
   0xf   : > { %177 = sbr.rel (%p174_p10) target bundleno = 180 (0xb4), region = 32  ;;  %s358_s10 = sshll.u32 (!%p174_p10), %s203_s9, 3 }
  0x10   : > { %s363_s11 = sshll.u32 (!%p174_p10), %s494_s15, 7  ;;  %s205_s18 = scalar_lea.vmem (!%p174_p10), [#allocation2], %s358_s10 }
  0x11   : > { %s258_s19 = sshll.u32 (!%p174_p10), %s205_s18, 4  ;;  %s505_s29 = smov (!%p174_p10), [#allocation2]   ;;  %s259_s19 = int_to_ptr.vmem [resolvable:$true] %s258_s19 }
  0x12   : > { %s426_s28 = scalar_lea.vmem (!%p174_p10), %s259_s19, 128 }
  0x13   : > { %p427_p12 = scmp.ne.s32.totalorder (!%p174_p10), %s259_s19, %s426_s28 }
  0x14   : > { %v504_v0 = vmov 0   ;;  %s207_s26 = scalar_select %p206_p11, %s494_s15, 1  ;;  %v361_v4 = vld [vmem:[%s633_s2] ss:$0 sm:$0xff] }
  0x15   : > { %423 = vset.pattern.permute.xlu0 %v504_v0  ;;  %p428_p13 = pnand %p427_p12, %p566_p4 }
  0x16   : > { %s359_s27 = sshll.u32 %s207_s26, 3  ;;  %s256_s26 = scalar_lea.hbm %s634_s3, %s363_s11 }
  0x17   : > { %s216_s30 = scalar_lea.vmem %s632_s1, %s359_s27  ;;  %s212_s6 = scalar_lea.vmem %s631_s0, %s359_s27 }
  0x18   : > { %v225_v1 = vld [vmem:[%s216_s30] sm:$0xff]  ;;  %s245_s27 = scalar_lea.sflag [#allocation3], %s203_s9  ;;  %p429_p0 = pneg %p428_p13 }
  0x19   : > { %228 = vperm.xlu0 %423, %v225_v1   ;;  %v235_v2 = vld [vmem:[%s212_s6] sm:$0xff]  ;;  %s430_s30 = sshll.u32 %s505_s29, 4  ;;  %s431_s30 = int_to_ptr.vmem [resolvable:$false] %s430_s30 }
  0x1a   : > { %v236_v3 = vadd.f32 1e-08, %v235_v2  ;;  %s432_s4 = scalar_lea.vmem %s431_s30, 256  ;;  %p433_p1 = scmp.lt.s32.totalorder %s259_s19, %s431_s30 }
  0x1b   : > { %p434_p2 = scmp.lt.s32.totalorder %s432_s4, %s426_s28 }
  0x1d   : > { %p435_p3 = por %p434_p2, %p433_p1 }
  0x1f   : > { %p436_p5 = pnand %p435_p3, %p429_p0 }
  0x94   : > { %v229_v5 = vpop.permute.xlu0 %228 }
  0x95   : > { %vm234_vm0 = vcmp.eq.s32.totalorder %v229_v5, %v361_v4 }
  0x96   : > { %v237_v6 = vsel %vm234_vm0, %v236_v3, 1.0 }
  0x97   : > { %424 = vlog2.f32 %v237_v6 }
  0xa4   : > { %v425_v7 = vpop.eup %424 }
  0xa5   : > { %v239_v8 = vmul.f32 0.6931472, %v425_v7 }
  0xa7   : > { %243 = vst [vmem:[%s205_s18] sm:$0xff] %v239_v8 }
  0xa8   : > { %439 = shalt.err (!%p436_p5)
}
  0xa9   : > { %s440_s15 = scalar_lea.hbm %s256_s26, 128  ;;  %s444_s7 = scalar_lea.hbm %s634_s3, 256 }
  0xaa   : > { %p441_p6 = scmp.ne.s32.totalorder %s256_s26, %s440_s15  ;;  %p445_p10 = scmp.lt.s32.totalorder %s256_s26, %s634_s3 }
  0xab   : > { %p446_p11 = scmp.lt.s32.totalorder %s444_s7, %s440_s15 }
  0xac   : > { %p442_p7 = pnand %p441_p6, %p566_p4 }
  0xad   : > { %p447_p12 = por %p446_p11, %p445_p10 }
  0xae   : > { %p443_p9 = pneg %p442_p7 }
  0xb0   : > { %p448_p13 = pnand %p447_p12, %p443_p9 }
  0xb2   : > { %451 = shalt.err (!%p448_p13)
}
  0xb3   : > { %366 = dma.vmem_to_hbm [thread:$0]  (%p566_p4), %s259_s19, 128, %s256_s26, %s245_s27  }
  0xb4 PF: > { %p372_p0 = scmp.ge.s32.totalorder %s502_s17, 2  ;;  %s270_s10 = sand.u32 1, %s482_s12  }
  0xb5   : > { %s271_s11 = scalar_lea.sflag [#allocation3], %s270_s10 }
  0xb6   : > { %p369_p1 = pnand %p372_p0, %p573_p8 }
  0xb8   : > { %p370_p2 = pneg %p369_p1 }
  0xba   : > { %477 = dma.done.wait (%p370_p2), %s271_s11, 128  }
  0xbb   : > { %479 = vsyncadd (%p370_p2), %s271_s11, 4294967168  ;;  %s16_s17 = sadd.s32 1, %s502_s17   ;;  %s637_s12 = smov %s486_s13 }
  0xbc   : > { %p13_p3 = scmp.ge.s32.totalorder %s16_s17, 4   ;;  %s638_s13 = smov %s490_s14 }
  0xbd   : > { %s639_s14 = smov %s579_s25  ;;  %s640_s15 = smov %s498_s16 }
  0xbe   : > { %s641_s16 = smov %s643_s20  ;;  %15 = sbr.rel (!%p13_p3) target bundleno = 4 (0x4), region = 77 }
  0xc3   :  { %276 = vsyncpa [#allocation3], 1 }
  0xc4   :  { %278 = vsyncpa [#allocation3 + $0x1], 1 }

</bundles_post_ra>
